<compile_context>
chip_gen: v7x
topology: tpu7x:2x2x1
jax: 0.10.0
libtpu: 0.0.40
codegen_flags: <defaults>
</compile_context>

<pallas_src>
import functools

import jax
import jax.numpy as jnp
from jax.experimental import pallas as pl
from jax.experimental.pallas import tpu as pltpu


def _qattention_kernel(q_ref, k_ref, v_ref, wT_ref, b_ref, o_ref, *,
                       batch_block, Lq, Lk, feat, inv_temperature):
    wT = wT_ref[...]                       # (F, F), pre-transposed: x @ wT == Conv1d_k1(x)
    bias = b_ref[...]                      # (1, F), broadcasts over rows

    # 2-D views for the shared-weight projections (leading-dim collapse is a
    # tile-aligned reshape when Lq/Lk are multiples of 8; still correct, just
    # relayout copies, otherwise).
    q2 = q_ref[...].reshape(batch_block * Lq, feat)
    k2 = k_ref[...].reshape(batch_block * Lk, feat)
    v2 = v_ref[...].reshape(batch_block * Lk, feat)

    # Conv1d(kernel_size=1) == x @ W.T + b.  1/temperature folded into the
    # (smaller) projq tile instead of scaling the scores matrix.
    projq = (jnp.dot(q2, wT, preferred_element_type=jnp.float32) + bias) * inv_temperature
    projk = jnp.dot(k2, wT, preferred_element_type=jnp.float32) + bias
    projv = jnp.dot(v2, wT, preferred_element_type=jnp.float32) + bias

    projq = projq.reshape(batch_block, Lq, feat)
    projk = projk.reshape(batch_block, Lk, feat)
    projv = projv.reshape(batch_block, Lk, feat)

    # scores[b, i, j] = <projq[b, i], projk[b, j]>; features contracted on both
    # sides so no transpose of projk is materialized.
    scores = jnp.einsum('bqf,bkf->bqk', projq, projk,
                        preferred_element_type=jnp.float32)          # (Bblk, Lq, Lk)

    # Softmax over the QUERY axis (torch.nn.Softmax(dim=0) on each instance's
    # (Lq, Lk) matrix).  Cross-sublane reductions use the otherwise-idle XLU.
    m = jnp.max(scores, axis=1, keepdims=True)                       # (Bblk, 1, Lk)
    e = jnp.exp(scores - m)                                          # (Bblk, Lq, Lk)
    denom = jnp.sum(e, axis=1, keepdims=True)                        # (Bblk, 1, Lk)
    # Exact reciprocal on the small row + broadcast multiply (not a per-element
    # divide over the whole (Lq, Lk) tile).
    attn = e * pl.reciprocal(denom, approx=False)                    # (Bblk, Lq, Lk)

    out = jnp.einsum('bqk,bkf->bqf', attn, projv,
                     preferred_element_type=jnp.float32)             # (Bblk, Lq, F)

    # Lane-dense output slab: instance i of this block lives at lanes
    # [i*F, (i+1)*F) of a single (Lq, Bblk*F) store.
    slab = jnp.concatenate([out[i] for i in range(batch_block)], axis=-1)
    o_ref[...] = slab.astype(o_ref.dtype)


def qattention_pallas(q, k, v, weight, bias, *, batch_block=None):
    """Batched QAttention.

    q: (B, Lq, F) or (Lq, F); k, v: (B, Lk, F) or (Lk, F);
    weight: (F, F) Conv1d(kernel_size=1) weight (out, in); bias: (F,).
    batch_block: instances per grid step; default picks the largest divisor of
    B that still yields >= 2 grid steps (both v7x TensorCores busy).
    """
    squeeze = q.ndim == 2
    if squeeze:
        q, k, v = q[None], k[None], v[None]
    B, Lq, feat = q.shape
    _, Lk, _ = k.shape

    if batch_block is None:
        # Fewer, bigger steps amortize the ~0.35 us/step overhead; keep >= 2
        # steps when B >= 2 so v7x's two TensorCores both get work.
        if B < 2:
            batch_block = B
        else:
            batch_block = max(d for d in range(1, B // 2 + 1) if B % d == 0)
    assert B % batch_block == 0, "batch_block must divide the batch size"
    nsteps = B // batch_block

    # Wrapper-side layout plumbing (not compute hoisting): pre-transpose the
    # tiny (F, F) parameter so the kernel's dots consume it directly.
    wT = weight.T                                      # (F_in, F_out)
    bias2d = bias.reshape(1, feat)
    inv_temperature = 1.0 / (float(feat) ** 0.5)

    kernel = functools.partial(
        _qattention_kernel,
        batch_block=batch_block, Lq=Lq, Lk=Lk, feat=feat,
        inv_temperature=inv_temperature)

    out = pl.pallas_call(
        kernel,
        out_shape=jax.ShapeDtypeStruct((nsteps, Lq, batch_block * feat), jnp.float32),
        grid=(nsteps,),
        in_specs=[
            # Per-step blocks of batch_block independent instances.
            pl.BlockSpec((batch_block, Lq, feat), lambda s: (s, 0, 0)),
            pl.BlockSpec((batch_block, Lk, feat), lambda s: (s, 0, 0)),
            pl.BlockSpec((batch_block, Lk, feat), lambda s: (s, 0, 0)),
            # Parameters: same block every grid step (fetched once).
            pl.BlockSpec((feat, feat), lambda s: (0, 0)),
            pl.BlockSpec((1, feat), lambda s: (0, 0)),
        ],
        # Lane-dense per-step output slab (last dim = batch_block*F).
        out_specs=pl.BlockSpec((None, Lq, batch_block * feat), lambda s: (s, 0, 0)),
        compiler_params=pltpu.CompilerParams(
            dimension_semantics=("parallel",),
        ),
    )(q, k, v, wT, bias2d)

    # Undo the lane-dense packing: (nsteps, Lq, Bblk*F) -> (B, Lq, F).
    out = out.reshape(nsteps, Lq, batch_block, feat)
    out = jnp.transpose(out, (0, 2, 1, 3)).reshape(B, Lq, feat)
    return out[0] if squeeze else out


def qattention_reference(q, k, v, weight, bias):
    """Pure-JAX reference mirroring the PyTorch forward (eval mode), single instance."""
    temperature = float(q.shape[-1]) ** 0.5
    proj = lambda x: x @ weight.T + bias[None, :]
    attq = proj(q)                          # (Lq, F)
    attk = proj(k)                          # (Lk, F)
    attv = proj(v)                          # (Lk, F)
    scores = (attq @ attk.T) / temperature  # (Lq, Lk)
    attn = jax.nn.softmax(scores, axis=0)   # softmax over dim=0 (query axis)
    return attn @ attv


if __name__ == "__main__":
    # Small, module-consistent shapes: batch of 8 instances, seq 8, features 32.
    # (B=8 -> batch_block=4, grid=(2,): two parallel steps, 128-lane output slab.)
    B, Lq, Lk, F = 8, 8, 8, 32
    key = jax.random.PRNGKey(0)
    kq, kk, kv, kw, kb = jax.random.split(key, 5)

    q = jax.random.normal(kq, (B, Lq, F), dtype=jnp.float32)
    k = jax.random.normal(kk, (B, Lk, F), dtype=jnp.float32)
    v = jax.random.normal(kv, (B, Lk, F), dtype=jnp.float32)

    # Deterministic synthetic Conv1d(kernel_size=1) parameters: weight (F, F), bias (F,).
    weight = jax.random.normal(kw, (F, F), dtype=jnp.float32) * (1.0 / (F ** 0.5))
    bias = jax.random.normal(kb, (F,), dtype=jnp.float32) * 0.1

    ref_b = jax.vmap(lambda a, b_, c: qattention_reference(a, b_, c, weight, bias))(q, k, v)

    # 1) Batched path: grid=(2,), batch_block=4, lane-dense (8, 128) output slabs.
    out_b = jax.block_until_ready(qattention_pallas(q, k, v, weight, bias))
    assert out_b.shape == (B, Lq, F)
    assert jnp.allclose(out_b, ref_b, atol=2e-3, rtol=2e-3), "batched mismatch"

    # 2) Single-instance path (matches the PyTorch module call signature).
    out_s = jax.block_until_ready(qattention_pallas(q[0], k[0], v[0], weight, bias))
    assert out_s.shape == (Lq, F)
    assert jnp.allclose(out_s, ref_b[0], atol=2e-3, rtol=2e-3), "single-instance mismatch"

    # 3) Explicit batch_block=2 (grid of 4 steps) still matches.
    out_b2 = jax.block_until_ready(
        qattention_pallas(q, k, v, weight, bias, batch_block=2))
    assert jnp.allclose(out_b2, ref_b, atol=2e-3, rtol=2e-3), "batch_block=2 mismatch"

    print("KERNEL_OK")
</pallas_src>

<mosaic_0001>
module attributes {stable_mosaic.version = 11 : i64} {
  func.func @_qattention_kernel(%arg0: i32, %arg1: memref<4x8x32xf32, #tpu.memory_space<vmem>>, %arg2: memref<4x8x32xf32, #tpu.memory_space<vmem>>, %arg3: memref<4x8x32xf32, #tpu.memory_space<vmem>>, %arg4: memref<32x32xf32, #tpu.memory_space<vmem>>, %arg5: memref<1x32xf32, #tpu.memory_space<vmem>>, %arg6: memref<1x8x128xf32, #tpu.memory_space<vmem>>) attributes {dimension_semantics = [#tpu.dimension_semantics<parallel>], iteration_bounds = array<i64: 2>, scalar_prefetch = 0 : i64, scratch_operands = 0 : i64, tpu.core_type = #tpu.core_type<tc>, window_params = [{transform_indices = @transform_0, window_bounds = array<i64: 4, 8, 32>}, {transform_indices = @transform_1, window_bounds = array<i64: 4, 8, 32>}, {transform_indices = @transform_2, window_bounds = array<i64: 4, 8, 32>}, {pipeline_mode = #tpu.pipeline_mode<synchronous>, transform_indices = @transform_3, window_bounds = array<i64: 32, 32>}, {pipeline_mode = #tpu.pipeline_mode<synchronous>, transform_indices = @transform_4, window_bounds = array<i64: 1, 32>}, {transform_indices = @transform_5, window_bounds = array<i64: 1, 8, 128>}]} {
    %c0 = arith.constant 0 : index
    %c0_0 = arith.constant 0 : index
    %0 = vector.load %arg4[%c0, %c0_0] : memref<32x32xf32, #tpu.memory_space<vmem>>, vector<32x32xf32>
    %c0_1 = arith.constant 0 : index
    %c0_2 = arith.constant 0 : index
    %1 = vector.load %arg5[%c0_1, %c0_2] : memref<1x32xf32, #tpu.memory_space<vmem>>, vector<1x32xf32>
    %c0_3 = arith.constant 0 : index
    %c0_4 = arith.constant 0 : index
    %c0_5 = arith.constant 0 : index
    %2 = vector.load %arg1[%c0_3, %c0_4, %c0_5] : memref<4x8x32xf32, #tpu.memory_space<vmem>>, vector<4x8x32xf32>
    %3 = vector.shape_cast %2 : vector<4x8x32xf32> to vector<32x32xf32>
    %c0_6 = arith.constant 0 : index
    %c0_7 = arith.constant 0 : index
    %c0_8 = arith.constant 0 : index
    %4 = vector.load %arg2[%c0_6, %c0_7, %c0_8] : memref<4x8x32xf32, #tpu.memory_space<vmem>>, vector<4x8x32xf32>
    %5 = vector.shape_cast %4 : vector<4x8x32xf32> to vector<32x32xf32>
    %c0_9 = arith.constant 0 : index
    %c0_10 = arith.constant 0 : index
    %c0_11 = arith.constant 0 : index
    %6 = vector.load %arg3[%c0_9, %c0_10, %c0_11] : memref<4x8x32xf32, #tpu.memory_space<vmem>>, vector<4x8x32xf32>
    %7 = vector.shape_cast %6 : vector<4x8x32xf32> to vector<32x32xf32>
    %cst = arith.constant dense<0.000000e+00> : vector<32x32xf32>
    %8 = tpu.matmul %3, %0, %cst {dimension_numbers = #tpu.dot_dimension_numbers<[1], [0], [0], [1], [0, 0, 1, 1], [], []>} : vector<32x32xf32>, vector<32x32xf32>, vector<32x32xf32> -> vector<32x32xf32>
    %9 = vector.broadcast %1 : vector<1x32xf32> to vector<32x32xf32>
    %10 = arith.addf %8, %9 : vector<32x32xf32>
    %cst_12 = arith.constant 0.176776692 : f32
    %11 = vector.broadcast %cst_12 : f32 to vector<32x32xf32>
    %12 = arith.mulf %10, %11 : vector<32x32xf32>
    %cst_13 = arith.constant dense<0.000000e+00> : vector<32x32xf32>
    %13 = tpu.matmul %5, %0, %cst_13 {dimension_numbers = #tpu.dot_dimension_numbers<[1], [0], [0], [1], [0, 0, 1, 1], [], []>} : vector<32x32xf32>, vector<32x32xf32>, vector<32x32xf32> -> vector<32x32xf32>
    %14 = vector.broadcast %1 : vector<1x32xf32> to vector<32x32xf32>
    %15 = arith.addf %13, %14 : vector<32x32xf32>
    %cst_14 = arith.constant dense<0.000000e+00> : vector<32x32xf32>
    %16 = tpu.matmul %7, %0, %cst_14 {dimension_numbers = #tpu.dot_dimension_numbers<[1], [0], [0], [1], [0, 0, 1, 1], [], []>} : vector<32x32xf32>, vector<32x32xf32>, vector<32x32xf32> -> vector<32x32xf32>
    %17 = vector.broadcast %1 : vector<1x32xf32> to vector<32x32xf32>
    %18 = arith.addf %16, %17 : vector<32x32xf32>
    %19 = vector.shape_cast %12 : vector<32x32xf32> to vector<4x8x32xf32>
    %20 = vector.shape_cast %15 : vector<32x32xf32> to vector<4x8x32xf32>
    %21 = vector.shape_cast %18 : vector<32x32xf32> to vector<4x8x32xf32>
    "tpu.trace_start"() <{level = 10 : i32, message = "bqf,bkf->bqk"}> : () -> ()
    %cst_15 = arith.constant dense<0.000000e+00> : vector<4x8x8xf32>
    %22 = tpu.matmul %19, %20, %cst_15 {dimension_numbers = #tpu.dot_dimension_numbers<[2], [2], [1], [1], [0, 0, 0, 1, 1, 1], [0], [0]>} : vector<4x8x32xf32>, vector<4x8x32xf32>, vector<4x8x8xf32> -> vector<4x8x8xf32>
    "tpu.trace_stop"() : () -> ()
    %cst_16 = arith.constant dense<0xFF800000> : vector<4x8xf32>
    %23 = vector.multi_reduction <maximumf>, %22, %cst_16 [1] : vector<4x8x8xf32> to vector<4x8xf32>
    %24 = vector.shape_cast %23 : vector<4x8xf32> to vector<4x1x8xf32>
    %25 = vector.broadcast %24 : vector<4x1x8xf32> to vector<4x8x8xf32>
    %26 = arith.subf %22, %25 : vector<4x8x8xf32>
    %27 = math.exp %26 : vector<4x8x8xf32>
    %cst_17 = arith.constant dense<0.000000e+00> : vector<4x8xf32>
    %28 = vector.multi_reduction <add>, %27, %cst_17 [1] : vector<4x8x8xf32> to vector<4x8xf32>
    %29 = vector.shape_cast %28 : vector<4x8xf32> to vector<4x1x8xf32>
    %30 = tpu.reciprocal %29 : vector<4x1x8xf32> -> vector<4x1x8xf32>
    %31 = vector.broadcast %30 : vector<4x1x8xf32> to vector<4x8x8xf32>
    %32 = arith.mulf %27, %31 : vector<4x8x8xf32>
    "tpu.trace_start"() <{level = 10 : i32, message = "bqk,bkf->bqf"}> : () -> ()
    %cst_18 = arith.constant dense<0.000000e+00> : vector<4x8x32xf32>
    %33 = tpu.matmul %32, %21, %cst_18 {dimension_numbers = #tpu.dot_dimension_numbers<[2], [1], [1], [2], [0, 0, 0, 1, 1, 2], [0], [0]>} : vector<4x8x8xf32>, vector<4x8x32xf32>, vector<4x8x32xf32> -> vector<4x8x32xf32>
    "tpu.trace_stop"() : () -> ()
    %34 = vector.extract_strided_slice %33 {offsets = [0, 0, 0], sizes = [1, 8, 32], strides = [1, 1, 1]} : vector<4x8x32xf32> to vector<1x8x32xf32>
    %35 = vector.shape_cast %34 : vector<1x8x32xf32> to vector<8x32xf32>
    %36 = vector.extract_strided_slice %33 {offsets = [1, 0, 0], sizes = [1, 8, 32], strides = [1, 1, 1]} : vector<4x8x32xf32> to vector<1x8x32xf32>
    %37 = vector.shape_cast %36 : vector<1x8x32xf32> to vector<8x32xf32>
    %38 = vector.extract_strided_slice %33 {offsets = [2, 0, 0], sizes = [1, 8, 32], strides = [1, 1, 1]} : vector<4x8x32xf32> to vector<1x8x32xf32>
    %39 = vector.shape_cast %38 : vector<1x8x32xf32> to vector<8x32xf32>
    %40 = vector.extract_strided_slice %33 {offsets = [3, 0, 0], sizes = [1, 8, 32], strides = [1, 1, 1]} : vector<4x8x32xf32> to vector<1x8x32xf32>
    %41 = vector.shape_cast %40 : vector<1x8x32xf32> to vector<8x32xf32>
    %42 = tpu.concatenate %35, %37, %39, %41 in 1 : vector<8x32xf32>, vector<8x32xf32>, vector<8x32xf32>, vector<8x32xf32> -> vector<8x128xf32>
    %c0_19 = arith.constant 0 : index
    %c0_20 = arith.constant 0 : index
    %c0_21 = arith.constant 0 : index
    %43 = vector.load %arg6[%c0_19, %c0_20, %c0_21] : memref<1x8x128xf32, #tpu.memory_space<vmem>>, vector<1x8x128xf32>
    %44 = vector.shape_cast %43 : vector<1x8x128xf32> to vector<8x128xf32>
    %45 = vector.shape_cast %42 : vector<8x128xf32> to vector<1x8x128xf32>
    tpu.vector_store %arg6[%c0_19, %c0_20, %c0_21], %45 {strides = array<i32>} : memref<1x8x128xf32, #tpu.memory_space<vmem>>, vector<1x8x128xf32>,
    return
  }
  func.func @transform_0(%arg0: i32) -> (i32, i32, i32) {
    %c0_i32 = arith.constant 0 : i32
    %c0_i32_0 = arith.constant 0 : i32
    %c0_i32_1 = arith.constant 0 : i32
    return %arg0, %c0_i32, %c0_i32_0 : i32, i32, i32
  }
  func.func @transform_1(%arg0: i32) -> (i32, i32, i32) {
    %c0_i32 = arith.constant 0 : i32
    %c0_i32_0 = arith.constant 0 : i32
    %c0_i32_1 = arith.constant 0 : i32
    return %arg0, %c0_i32, %c0_i32_0 : i32, i32, i32
  }
  func.func @transform_2(%arg0: i32) -> (i32, i32, i32) {
    %c0_i32 = arith.constant 0 : i32
    %c0_i32_0 = arith.constant 0 : i32
    %c0_i32_1 = arith.constant 0 : i32
    return %arg0, %c0_i32, %c0_i32_0 : i32, i32, i32
  }
  func.func @transform_3(%arg0: i32) -> (i32, i32) {
    %c0_i32 = arith.constant 0 : i32
    %c0_i32_0 = arith.constant 0 : i32
    %c0_i32_1 = arith.constant 0 : i32
    return %c0_i32, %c0_i32_0 : i32, i32
  }
  func.func @transform_4(%arg0: i32) -> (i32, i32) {
    %c0_i32 = arith.constant 0 : i32
    %c0_i32_0 = arith.constant 0 : i32
    %c0_i32_1 = arith.constant 0 : i32
    return %c0_i32, %c0_i32_0 : i32, i32
  }
  func.func @transform_5(%arg0: i32) -> (i32, i32, i32) {
    %c0_i32 = arith.constant 0 : i32
    %c0_i32_0 = arith.constant 0 : i32
    %c0_i32_1 = arith.constant 0 : i32
    return %arg0, %c0_i32, %c0_i32_0 : i32, i32, i32
  }
}

</mosaic_0001>

<bundles_post_ra>
// kernel: tpu_custom_call.1
= control target key start
LH: loop header
LB: loop body
LE: loop exit
PB: predicated region body
PF: predicated region fallthrough
CT: control target
= control target key end

     0   :  { %s2404_s0 = inlined_call_operand.hbm [shape: f32[8,8,32], index: 0, kind: input, shape index: {}]   ;;  %s2405_s1 = inlined_call_operand.hbm [shape: f32[8,8,32], index: 1, kind: input, shape index: {}]   ;;  %s2406_s2 = inlined_call_operand.hbm [shape: f32[8,8,32], index: 2, kind: input, shape index: {}]   ;;  %s2407_s3 = inlined_call_operand.hbm [shape: f32[32,32], index: 3, kind: input, shape index: {}]   ;;  %s2408_s4 = inlined_call_operand.vmem [shape: f32[1,32], index: 4, kind: input, shape index: {}]   ;;  %s2409_s5 = inlined_call_operand.hbm [shape: f32[2,8,128], index: 5, kind: output, shape index: {}]  }
   0x1   :  { %2429 = sst [smem:[#allocation21_spill]] %s2404_s0 }
   0x2   :  { %2430 = sst [smem:[#allocation22_spill]] %s2405_s1 }
   0x3   :  { %10 = vsyncpa [#allocation3], 0 }
   0x4   :  { %12 = vsyncpa [#allocation3 + $0x1], 0 }
   0x5   :  { %13 = vsyncpa [#allocation6], 0 }
   0x6   :  { %15 = vsyncpa [#allocation6 + $0x1], 0 }
   0x7   :  { %16 = vsyncpa [#allocation9], 0 }
   0x8   :  { %17 = vsyncpa [#allocation4], 0 }
   0x9   :  { %19 = vsyncpa [#allocation4 + $0x1], 0  ;;  %s2008_s18 = smov 0   ;;  %s2010_s19 = smov 0  }
   0xa   :  { %s2012_s20 = smov 0   ;;  %s2014_s21 = smov 0  }
   0xb LB: > { %2431 = sst [smem:[#allocation15_spill]] %s1952_s18  ;;  %s2029_s22 = sadd.s32 1, %s1964_s21   ;;  %s1964_s21 = sphi %s2014_s21, %s2462_s21   ;;  %s1960_s20 = sphi %s2012_s20, %s2467_s20   ;;  %s1956_s19 = sphi %s2010_s19, %s2466_s19   ;;  %s1952_s18 = sphi %s2008_s18, %s2465_s18  }
   0xc   : > { %2432 = sst [smem:[#allocation16_spill]] %s1960_s20  ;;  %s32_s23 = sadd.s32 1, %s1960_s20 }
   0xd   : > { %2433 = sst [smem:[#allocation17_spill]] %s1964_s21  ;;  %s29_s24 = ssub.s32 %s1964_s21, %s2029_s22 }
   0xe   : > { %2434 = sst [smem:[#allocation18_spill]] %s2029_s22  ;;  %p2410_p0 = scmp.ne.s32.totalorder %s1960_s20, %s1956_s19 }
   0xf   : > { %p30_p1 = scmp.eq.s32.totalorder %s29_s24, 0  ;;  %p40_p2 = scmp.eq.s32.totalorder %s1964_s21, 0 }
  0x10   : > { %p1713_p5 = scmp.lt.s32.totalorder %s1964_s21, 2  ;;  %s205_s26 = sand.u32 1, %s1960_s20  }
  0x11   : > { %s2038_s25 = scalar_select %p30_p1, %s1960_s20, %s32_s23  }
  0x12   : > { %p41_p3 = por %p40_p2, %p2410_p0  ;;  %s2048_s27 = sshll.u32 %s205_s26, 5 }
  0x13   : > { %2435 = sst [smem:[#allocation19_spill]] %s2038_s25  ;;  %s2051_s28 = sshll.u32 %s1964_s21, 9 }
  0x14   : > { %p2053_p6 = pnand %p1713_p5, %p41_p3  ;;  %s226_s30 = sand.u32 1, %s1964_s21  }
  0x15   : > { %s2437_s1 = sld [smem:[#allocation22_spill]]  ;;  %s230_s9 = scalar_lea.vmem [#allocation5], %s2048_s27 }
  0x16   : > { %s2436_s29 = scalar_select %p2053_p6, 1, 0 }
  0x17   : > { %s237_s10 = sshll.u32 %s230_s9, 4  ;;  %s2067_s11 = scalar_lea.sflag [#allocation6], %s226_s30  ;;  %s2065_s10 = int_to_ptr.vmem [resolvable:$true] %s237_s10 }
  0x18   : > { %p2073_p8 = pneg %p2053_p6 }
  0x1a   : > { %s2438_s13 = scalar_select %p2073_p8, 1, 0 }
  0x1b   : > { %s2062_s8 = scalar_lea.hbm %s2437_s1, %s2051_s28  ;;  %s1777_s16 = scalar_lea.hbm %s2437_s1, 1024 }
  0x1c   : > { %s1772_s12 = scalar_lea.hbm %s2062_s8, 512  ;;  %p1778_p11 = scmp.lt.u32.totalorder %s2062_s8, %s2437_s1 }
  0x1d   : > { %p1773_p7 = scmp.ne.s32.totalorder %s2062_s8, %s1772_s12  ;;  %p1779_p12 = scmp.lt.u32.totalorder %s1777_s16, %s1772_s12 }
  0x1e   : > { %p1781_p1 = scmp.lt.u32.totalorder %s1772_s12, %s2062_s8 }
  0x1f   : > { %p1775_p9 = pnand %p2073_p8, %p1773_p7  ;;  %p1780_p13 = por %p1779_p12, %p1778_p11 }
  0x21   : > { %p1776_p10 = pneg %p1775_p9  ;;  %p1782_p2 = por %p1781_p1, %p1780_p13 }
  0x23   : > { %p1783_p3 = pnand %p1782_p2, %p1776_p10 }
  0x25   : > { %1786 = shalt.err (!%p1783_p3)
}
  0x26   : > { %s1787_s24 = scalar_lea.vmem %s2065_s10, 512  ;;  %s1966_s30 = smov [#allocation5]  }
  0x27   : > { %p1788_p5 = scmp.ne.s32.totalorder %s2065_s10, %s1787_s24  ;;  %s1792_s6 = sshll.u32 %s1966_s30, 4  ;;  %s1793_s6 = int_to_ptr.vmem [resolvable:$false] %s1792_s6 }
  0x28   : > { %s1794_s7 = scalar_lea.vmem %s1793_s6, 1024  ;;  %p1795_p4 = scmp.lt.s32.totalorder %s2065_s10, %s1793_s6 }
  0x29   : > { %p1790_p7 = pnand %p1788_p5, %p2073_p8  ;;  %p1796_p0 = scmp.lt.s32.totalorder %s1794_s7, %s1787_s24 }
  0x2b   : > { %p1791_p9 = pneg %p1790_p7  ;;  %p1797_p11 = por %p1796_p0, %p1795_p4 }
  0x2d   : > { %p1798_p12 = pnand %p1797_p11, %p1791_p9 }
  0x2f   : > { %1801 = shalt.err (!%p1798_p12)
}
  0x30   : > { %s2411_s9 = smov 128   ;;  %s2413_s12 = smov 8  }
  0x31   : > { %1704 = dma.hbm_to_vmem [thread:$0]  (!%p2053_p6), %s2062_s8, 512, %s2065_s10, %s2067_s11, %s2411_s9, %s2411_s9, %s2413_s12  }
  0x32   : > { %s2101_s14 = sadd.s32 4294967295, %s1964_s21   ;;  %s1485_s15 = sadd.s32 4294967294, %s1964_s21  }
  0x33   : > { %p45_p0 = scmp.ne.s32.totalorder %s1956_s19, %s1952_s18  ;;  %p2417_p4 = scmp.eq.s32.totalorder %s2101_s14, 0 }
  0x34   : > { %p163_p10 = scmp.eq.s32.totalorder %s2101_s14, 1  ;;  %p169_p13 = scmp.eq.s32.totalorder %s1485_s15, 1 }
  0x35   : > { %p2110_p1 = por %p2417_p4, %p45_p0  ;;  %p1486_p2 = scmp.ge.s32.totalorder %s1964_s21, 1 }
  0x36   : > { %p2440_p3 = scmp.ne.s32.totalorder %s1960_s20, %s1956_s19  ;;  %p2122_p7 = por %p169_p13, %p45_p0 }
  0x37   : > { %s2439_s16 = scalar_select %p2110_p1, 1, 0 }
  0x38   : > { %p2118_p5 = por %p163_p10, %p2440_p3  ;;  %p176_p9 = scmp.lt.s32.totalorder %s1964_s21, 3 }
  0x39   : > { %s2442_s10 = scalar_select %p2122_p7, 1, 0 }
  0x3a   : > { %s2441_s8 = scalar_select %p2118_p5, 1, 0 }
  0x3b   : > { %2443 = sst [smem:[#allocation20_spill]] %s2442_s10  ;;  %p2127_p11 = pnand %p1486_p2, %p176_p9 }
  0x3c   : > { %s1969_s23 = smov [#allocation8]   ;;  %s2445_s0 = sld [smem:[#allocation21_spill]] }
  0x3d   : > { %s2444_s17 = scalar_select %p2127_p11, 1, 0 }
  0x3e   : > { %s188_s24 = sshll.u32 %s1969_s23, 4  ;;  %p1694_p12 = pneg %p2127_p11  ;;  %s2131_s24 = int_to_ptr.vmem [resolvable:$true] %s188_s24 }
  0x3f   : > { %s209_s15 = scalar_lea.vmem [#allocation2], %s2048_s27  ;;  %s2152_s23 = scalar_lea.sflag [#allocation3], %s205_s26 }
  0x40   : > { %s216_s9 = sshll.u32 %s209_s15, 4  ;;  %p2144_p0 = pnand %p1694_p12, %p2417_p4  ;;  %s2148_s9 = int_to_ptr.vmem [resolvable:$true] %s216_s9 }
  0x42   : > { %s2139_s7 = scalar_lea.hbm %s2445_s0, %s2051_s28  ;;  %s1807_s25 = scalar_lea.hbm %s2445_s0, 1024 }
  0x43   : > { %s2446_s12 = scalar_select %p2144_p0, 1, 0 }
  0x44   : > { %s1802_s1 = scalar_lea.hbm %s2139_s7, 512  ;;  %p1808_p3 = scmp.lt.u32.totalorder %s2139_s7, %s2445_s0 }
  0x45   : > { %p1803_p10 = scmp.ne.s32.totalorder %s2139_s7, %s1802_s1  ;;  %p1809_p9 = scmp.lt.u32.totalorder %s1807_s25, %s1802_s1 }
  0x46   : > { %p1811_p4 = scmp.lt.u32.totalorder %s1802_s1, %s2139_s7 }
  0x47   : > { %p1805_p13 = pnand %p1803_p10, %p2073_p8  ;;  %p1810_p12 = por %p1809_p9, %p1808_p3 }
  0x49   : > { %p1806_p2 = pneg %p1805_p13  ;;  %p1812_p7 = por %p1811_p4, %p1810_p12 }
  0x4b   : > { %p1813_p5 = pnand %p1812_p7, %p1806_p2 }
  0x4d   : > { %1816 = shalt.err (!%p1813_p5)
}
  0x4e   : > { %s1817_s26 = scalar_lea.vmem %s2148_s9, 512  ;;  %s1970_s30 = smov [#allocation2]  }
  0x4f   : > { %p1818_p10 = scmp.ne.s32.totalorder %s2148_s9, %s1817_s26  ;;  %s1822_s6 = sshll.u32 %s1970_s30, 4  ;;  %s1823_s6 = int_to_ptr.vmem [resolvable:$false] %s1822_s6 }
  0x50   : > { %s1824_s22 = scalar_lea.vmem %s1823_s6, 1024  ;;  %p1825_p11 = scmp.lt.s32.totalorder %s2148_s9, %s1823_s6 }
  0x51   : > { %p1820_p13 = pnand %p1818_p10, %p2073_p8  ;;  %p1826_p0 = scmp.lt.s32.totalorder %s1824_s22, %s1817_s26 }
  0x53   : > { %p1821_p1 = pneg %p1820_p13  ;;  %p1827_p3 = por %p1826_p0, %p1825_p11 }
  0x55   : > { %p1828_p9 = pnand %p1827_p3, %p1821_p1 }
  0x57   : > { %1831 = shalt.err (!%p1828_p9)
}
  0x58   : > { %s2447_s1 = smov 8   ;;  %s2448_s25 = smov 128  }
  0x59   : > { %1701 = dma.hbm_to_vmem [thread:$0]  (!%p2053_p6), %s2139_s7, 512, %s2148_s9, %s2152_s23, %s2448_s25, %s2448_s25, %s2447_s1  }
  0x5a   : > { %s2183_s0 = scalar_lea.hbm %s2406_s2, %s2051_s28  ;;  %s1832_s22 = scalar_lea.hbm %s2407_s3, 512 }
  0x5b   : > { %p1833_p4 = scmp.ne.s32.totalorder %s2407_s3, %s1832_s22  ;;  %p2449_p1 = scmp.ne.s32.totalorder %s2446_s12, 0 }
  0x5c   : > { %p1839_p0 = scmp.lt.u32.totalorder %s1832_s22, %s2407_s3 }
  0x5d   : > { %p1834_p5 = pneg %p2449_p1 }
  0x5f   : > { %p1835_p7 = pnand %p1834_p5, %p1833_p4 }
  0x61   : > { %p1836_p11 = pneg %p1835_p7 }
  0x63   : > { %p1841_p2 = pnand %p1839_p0, %p1836_p11 }
  0x65   : > { %1844 = shalt.err (!%p1841_p2)
}
  0x66   : > { %s1845_s28 = scalar_lea.vmem %s2131_s24, 512  ;;  %p1853_p3 = scmp.lt.s32.totalorder %s2131_s24, %s2131_s24 }
  0x67   : > { %p1846_p12 = scmp.ne.s32.totalorder %s2131_s24, %s1845_s28  ;;  %p1854_p9 = scmp.lt.s32.totalorder %s1845_s28, %s1845_s28 }
  0x69   : > { %p1848_p10 = pnand %p1846_p12, %p1834_p5  ;;  %p1855_p6 = por %p1854_p9, %p1853_p3 }
  0x6b   : > { %p1849_p13 = pneg %p1848_p10 }
  0x6d   : > { %p1856_p8 = pnand %p1855_p6, %p1849_p13 }
  0x6f   : > { %1859 = shalt.err (!%p1856_p8)
}
  0x70   : > { %1697 = dma.hbm_to_vmem [thread:$0]  (!%p2449_p1), %s2407_s3, 512, %s2131_s24, [#allocation9], %s2448_s25, %s2448_s25, %s2447_s1  }
  0x71   : > { %s251_s21 = scalar_lea.vmem [#allocation7], %s2048_s27  ;;  %s1860_s10 = scalar_lea.hbm %s2183_s0, 512 }
  0x72   : > { %s258_s9 = sshll.u32 %s251_s21, 4  ;;  %p1861_p6 = scmp.ne.s32.totalorder %s2183_s0, %s1860_s10  ;;  %s2210_s9 = int_to_ptr.vmem [resolvable:$true] %s258_s9 }
  0x73   : > { %p2450_p8 = scmp.ne.s32.totalorder %s2438_s13, 0  ;;  %s1865_s23 = scalar_lea.hbm %s2406_s2, 1024 }
  0x74   : > { %p1866_p7 = scmp.lt.u32.totalorder %s2183_s0, %s2406_s2  ;;  %p1867_p11 = scmp.lt.u32.totalorder %s1865_s23, %s1860_s10 }
  0x75   : > { %p1863_p4 = pnand %p1861_p6, %p2450_p8  ;;  %p1869_p1 = scmp.lt.u32.totalorder %s1860_s10, %s2183_s0 }
  0x76   : > { %p1868_p0 = por %p1867_p11, %p1866_p7 }
  0x77   : > { %p1864_p5 = pneg %p1863_p4 }
  0x78   : > { %p1870_p2 = por %p1869_p1, %p1868_p0 }
  0x7a   : > { %p1871_p12 = pnand %p1870_p2, %p1864_p5 }
  0x7c   : > { %1874 = shalt.err (!%p1871_p12)
}
  0x7d   : > { %s1875_s27 = scalar_lea.vmem %s2210_s9, 512  ;;  %s1971_s24 = smov [#allocation7]  }
  0x7e   : > { %p1876_p10 = scmp.ne.s32.totalorder %s2210_s9, %s1875_s27  ;;  %s1880_s26 = sshll.u32 %s1971_s24, 4  ;;  %s1881_s26 = int_to_ptr.vmem [resolvable:$false] %s1880_s26 }
  0x7f   : > { %s1882_s6 = scalar_lea.vmem %s1881_s26, 1024  ;;  %p1883_p9 = scmp.lt.s32.totalorder %s2210_s9, %s1881_s26 }
  0x80   : > { %p1878_p13 = pnand %p1876_p10, %p2450_p8  ;;  %p1884_p6 = scmp.lt.s32.totalorder %s1882_s6, %s1875_s27 }
  0x82   : > { %p1879_p3 = pneg %p1878_p13  ;;  %p1885_p4 = por %p1884_p6, %p1883_p9 }
  0x84   : > { %p1886_p7 = pnand %p1885_p4, %p1879_p3 }
  0x86   : > { %1889 = shalt.err (!%p1886_p7)
}
  0x87   : > { %p2451_p5 = scmp.ne.s32.totalorder %s2436_s29, 0  ;;  %p2452_p8 = scmp.ne.s32.totalorder %s2444_s17, 0 }
  0x88   : > { %s2240_s13 = sand.u32 (!%p2452_p8), 1, %s1956_s19   ;;  %p2453_p11 = scmp.ne.s32.totalorder (!%p2452_p8), %s2439_s16, 0 }
  0x89   : > { %1707 = dma.hbm_to_vmem [thread:$0]  (!%p2451_p5), %s2183_s0, 512, %s2210_s9, %s2067_s11, %s2448_s25, %s2448_s25, %s2447_s1  }
  0x8a   : > { %270 = sbr.rel (%p2452_p8) target bundleno = 998 (0x3e6), region = 40  ;;  %s1499_s22 = sshll.u32 (!%p2452_p8), %s2240_s13, 5 }
  0x8b   : > { %s273_s28 = scalar_lea.sflag (!%p2452_p8), [#allocation3], %s2240_s13  ;;  %s2244_s18 = scalar_lea.vmem (!%p2452_p8), [#allocation2], %s1499_s22 }
  0x91   : > { %1935 = dma.done.wait (%p2453_p11), %s273_s28, 512  }
  0x92   : > { %1937 = vsyncadd (%p2453_p11), %s273_s28, 4294966784  ;;  %s281_s0 = sand.u32 1, %s2101_s14   ;;  %s2251_s11 = scalar_lea.vmem [#allocation5], %s1499_s22 }
  0x93   : > { %s282_s29 = scalar_lea.sflag [#allocation6], %s281_s0 }
  0x94   : > { %1939 = dma.done.wait (%p2453_p11), %s282_s29, 1024  }
  0x95   : > { %1941 = vsyncadd (%p2453_p11), %s282_s29, 4294966272  ;;  %s2257_s17 = scalar_lea.vmem [#allocation7], %s1499_s22  ;;  %p2454_p0 = scmp.eq.s32.totalorder %s2101_s14, 0 }
  0x97   : > { %1943 = dma.done.wait (%p2454_p0), [#allocation9], 512   ;;  %p2455_p1 = pmov %p2454_p0 }
  0x98   : > { %vm361_vm0 = vcmask 261120   ;;  %v338_v0 = vld [vmem:[#allocation8] sm:$0xff]  ;;  %v339_v1 = vld [vmem:[#allocation8 + $0x8] sm:$0xff]  ;;  %v340_v2 = vld [vmem:[#allocation8 + $0x10] sm:$0xff]  ;;  %v1972_v16 = vmov 0.0   ;;  %vm1973_vm1 = vmmov 0  }
  0x99   : > { %1945 = vsyncadd (%p2455_p1), [#allocation9], 4294966784  ;;  %v1658_v3 = vpack.c.bf16 %v339_v1, %v338_v0  ;;  %v341_v4 = vld [vmem:[#allocation8 + $0x18] sm:$0xff]  ;;  %v347_v5 = vld [vmem:[%s2251_s11] sm:$0xff]  ;;  %vm961_vm2 = vcmask 64512   ;;  %s1974_s25 = smov 32  }
  0x9a   : > { %v343_v6 = vld [vmem:[%s2244_s18] sm:$0xff]  ;;  %v1662_v7 = vpack.c.bf16 %v341_v4, %v340_v2  ;;  %1598 = vmatprep.mubr.msk.f32.mxu1 %vm361_vm0, %v347_v5  ;;  %v348_v8 = vld [vmem:[%s2251_s11 + $0x8] sm:$0xff]  ;;  %v349_v10 = vld [vmem:[%s2251_s11 + $0x10] sm:$0xff]  ;;  %s1975_s20 = smov 64   ;;  %s1976_s21 = smov 96   ;;  %vm1343_vm3 = vcmask 523264  }
  0x9b   : > { %1584 = vmatprep.mubr.msk.f32.mxu0 %vm361_vm0, %v343_v6  ;;  %1667 = vmatprep.subr.bf16.mxu1 %v1658_v3  ;;  %v344_v9 = vld [vmem:[%s2244_s18 + $0x8] sm:$0xff]  ;;  %v345_v11 = vld [vmem:[%s2244_s18 + $0x10] sm:$0xff]  ;;  %v350_v12 = vld [vmem:[%s2251_s11 + $0x18] sm:$0xff]  ;;  %s1503_s9 = sshll.u32 %s2240_s13, 3  ;;  %s1530_s10 = sshll.u32 %s2101_s14, 7  ;;  %vm1345_vm4 = vcmask 785408  }
  0x9c   : > { %1659 = vmatprep.subr.bf16.mxu0 %v1658_v3  ;;  %1669 = vmatpush3.bf16.msra.mxu1 %v1658_v3  ;;  %v346_v13 = vld [vmem:[%s2244_s18 + $0x18] sm:$0xff]  ;;  %v351_v14 = vld [vmem:[%s2257_s17] sm:$0xff]  ;;  %v352_v15 = vld [vmem:[%s2257_s17 + $0x8] sm:$0xff]  ;;  %s334_s12 = scalar_lea.vmem [#allocation10], %s1503_s9  ;;  %s2360_s30 = scalar_lea.hbm %s2409_s5, %s1530_s10 }
  0x9d   : > { %1661 = vmatpush3.bf16.msra.mxu0 %v1658_v3  ;;  %1671 = vmatprep.subr.bf16.mxu1 %v1662_v7  ;;  %v353_v17 = vld [vmem:[%s2257_s17 + $0x10] sm:$0xff]  ;;  %v354_v18 = vld [vmem:[%s2257_s17 + $0x18] sm:$0xff]  ;;  %v2296_v19 = vld [vmem:[%s2408_s4] ss:$0 sm:$0xff]  ;;  %s1362_s7 = sshll.u32 %s334_s12, 4  ;;  %s1349_s14 = scalar_lea.sflag [#allocation4], %s2240_s13  ;;  %s2362_s7 = int_to_ptr.vmem [resolvable:$true] %s1362_s7 }
  0x9e   : > { %1663 = vmatprep.subr.bf16.mxu0 %v1662_v7  ;;  %s1890_s27 = scalar_lea.vmem %s2362_s7, 128  ;;  %p2456_p12 = scmp.ne.s32.totalorder %s2441_s8, 0 }
  0x9f   : > { %p1891_p2 = scmp.ne.s32.totalorder %s2362_s7, %s1890_s27  ;;  %s1977_s24 = smov [#allocation10]  }
  0xa0   : > { %1673 = vmatpush3.bf16.msra.mxu1 %v1662_v7  ;;  %s1894_s26 = sshll.u32 %s1977_s24, 4  ;;  %s1895_s26 = int_to_ptr.vmem [resolvable:$false] %s1894_s26 }
  0xa1   : > { %1665 = vmatpush3.bf16.msra.mxu0 %v1662_v7  ;;  %1618 = vmatprep.subr.mxu1 %v1972_v16  ;;  %p1892_p10 = pnand %p1891_p2, %p2456_p12  ;;  %s1896_s6 = scalar_lea.vmem %s1895_s26, 256 }
  0xa2   : > { %1675 = vmatprep.subr.bf16.mxu0 %v1658_v3  ;;  %p1897_p3 = scmp.lt.s32.totalorder %s2362_s7, %s1895_s26  ;;  %p1898_p9 = scmp.lt.s32.totalorder %s1896_s6, %s1890_s27 }
  0xa3   : > { %1599 = vmatmul.mubr.msk.f32.vlgmr.msra.gmra.mrb[0].mxu1 %vm361_vm0, %v348_v8  ;;  %p1893_p13 = pneg %p1892_p10 }
  0xa4   : > { %1585 = vmatmul.mubr.msk.f32.vlgmr.msra.gmra.mrb[0].mxu0 %vm361_vm0, %v344_v9  ;;  %1601 = vmatprep.mubr.msk.f32.mxu1 %vm361_vm0, %v349_v10  ;;  %p1899_p6 = por %p1898_p9, %p1897_p3 }
  0xa5   : > { %1587 = vmatprep.mubr.msk.f32.mxu0 %vm361_vm0, %v345_v11  ;;  %1677 = vmatpush3.bf16.msra.mxu0 %v1658_v3 }
  0xa6   : > { %1679 = vmatprep.subr.bf16.mxu0 %v1662_v7  ;;  %p1900_p4 = pnand %p1899_p6, %p1893_p13 }
  0xa7   : > { %1602 = vmatmul.mubr.msk.f32.gmra.mrb[2].mxu1 %vm361_vm0, %v350_v12 }
  0xa8   : > { %1588 = vmatmul.mubr.msk.f32.gmra.mrb[2].mxu0 %vm361_vm0, %v346_v13  ;;  %1620 = vmatprep.mubr.msk.f32.mxu1 %vm1973_vm1, %v1972_v16 }
  0xa9   : > { %1681 = vmatpush3.bf16.msra.mxu0 %v1662_v7  ;;  %1612 = vmatprep.mubr.msk.f32.mxu0 %vm361_vm0, %v351_v14 }
  0xaa   : > { %1628 = vmatprep.subr.mxu0 %v1972_v16 }
  0xac   : > { %1613 = vmatmul.mubr.msk.f32.vlgmr.msra.gmra.mrb[4].mxu0 %vm361_vm0, %v352_v15 }
  0xad   : > { %1615 = vmatprep.mubr.msk.f32.mxu0 %vm361_vm0, %v353_v17 }
  0xb0   : > { %1616 = vmatmul.mubr.msk.f32.gmra.mrb[6].mxu0 %vm361_vm0, %v354_v18 }
  0xb1   : > { %1630 = vmatprep.mubr.msk.f32.mxu0 %vm1973_vm1, %v1972_v16 }
 0x176   : > { %v1600_v20 = vpop.f32.mrb[0].mxu1 }
 0x177   : > { %v1586_v21 = vpop.f32.mrb[0].mxu0  ;;  %v541_v22 = vpop.f32.mrb[1].mxu1  ;;  %v547_v32 = vadd.f32 %v1600_v20, %v2296_v19 }
 0x178   : > { %v440_v23 = vpop.f32.mrb[1].mxu0  ;;  %v542_v24 = vadd.f32 %v2296_v19, %v541_v22  ;;  %v446_v29 = vadd.f32 %v1586_v21, %v2296_v19 }
 0x179   : > { %v441_v25 = vadd.f32 %v2296_v19, %v440_v23 }
 0x17a   : > { %v1603_v27 = vpop.f32.mrb[2].mxu1  ;;  %1619 = vmatpush3.xpose.msk.msra.mxu1 %vm361_vm0, %v542_v24  ;;  %v460_v38 = vmul.f32 0.17677669, %v446_v29 }
 0x17b   : > { %v459_v26 = vmul.f32 0.17677669, %v441_v25  ;;  %v1589_v28 = vpop.f32.mrb[2].mxu0  ;;  %v551_v30 = vpop.f32.mrb[3].mxu1  ;;  %1623 = vmatprep.subr.mxu1 %v1972_v16  ;;  %v557_v36 = vadd.f32 %v1603_v27, %v2296_v19 }
 0x17c   : > { %v450_v31 = vpop.f32.mrb[3].mxu0  ;;  %v552_v33 = vadd.f32 %v2296_v19, %v551_v30  ;;  %v456_v35 = vadd.f32 %v1589_v28, %v2296_v19 }
 0x17d   : > { %v451_v34 = vadd.f32 %v2296_v19, %v450_v31  ;;  %1621 = vmatmul.mubr.msk.f32.vlgmr.msra.gmra.mrb[4].mxu1 %vm361_vm0, %v459_v26 }
 0x17e   : > { %1624 = vmatpush3.xpose.msk.msra.mxu1 %vm361_vm0, %v547_v32  ;;  %1629 = vmatpush3.xpose.msk.msra.mxu0 %vm361_vm0, %v552_v33  ;;  %v462_v39 = vmul.f32 0.17677669, %v456_v35 }
 0x17f   : > { %v461_v37 = vmul.f32 0.17677669, %v451_v34  ;;  %1625 = vmatprep.mubr.msk.f32.mxu1 %vm1973_vm1, %v1972_v16  ;;  %1633 = vmatprep.subr.mxu1 %v1972_v16  ;;  %v1614_v40 = vpop.f32.mrb[4].mxu0 }
 0x180   : > { %1638 = vmatprep.subr.mxu0 %v1972_v16  ;;  %v644_v41 = vadd.f32 %v1614_v40, %v2296_v19  ;;  %v638_v42 = vpop.f32.mrb[5].mxu0 }
 0x181   : > { %1626 = vmatmul.mubr.msk.f32.vlgmr.msra.gmra.mrb[6].mxu1 %vm361_vm0, %v460_v38  ;;  %1631 = vmatmul.mubr.msk.f32.vlgmr.msra.gmra.mrb[8].mxu0 %vm361_vm0, %v461_v37  ;;  %v639_v43 = vadd.f32 %v2296_v19, %v638_v42 }
 0x182   : > { %1634 = vmatpush3.xpose.msk.msra.mxu1 %vm361_vm0, %v557_v36  ;;  %1635 = vmatprep.mubr.msk.f32.mxu1 %vm1973_vm1, %v1972_v16 }
 0x183   : > { %1643 = vmatprep.subr.mxu1 %v1972_v16  ;;  %1640 = vmatprep.mubr.msk.f32.mxu0 %vm1973_vm1, %v1972_v16  ;;  %v2329_v44 = vpop.f32.mrb[6].mxu0 }
 0x184   : > { %v2331_v45 = vpop.f32.mrb[7].mxu0  ;;  %1639 = vmatpush3.msra.mxu0 %v639_v43 }
 0x185   : > { %1636 = vmatmul.mubr.msk.f32.vlgmr.msra.gmra.mrb[8].mxu1 %vm361_vm0, %v462_v39  ;;  %1648 = vmatprep.subr.mxu0 %v1972_v16 }
 0x186   : > { %1645 = vmatprep.mubr.msk.f32.mxu1 %vm1973_vm1, %v1972_v16  ;;  %1644 = vmatpush3.msra.mxu1 %v644_v41 }
 0x187   : > { %1653 = vmatprep.subr.mxu1 %v1972_v16 }
 0x250   : > { %v729_v46 = vpop.f32.mrb[4].mxu1 }
 0x251   : > { %v962_v47 = vsel %vm961_vm2, %v729_v46, -inf  ;;  %v1622_v48 = vpop.f32.mrb[5].mxu1 }
 0x252   : > { %v963_v49 = vrot.slane %v962_v47, 4 }
 0x254   : > { %v964_v50 = vmax.f32 %v962_v47, %v963_v49  ;;  %v805_v51 = vpop.f32.mrb[6].mxu1  ;;  %v881_v52 = vpop.f32.mrb[8].mxu0 }
 0x255   : > { %v969_v53 = vsel %vm961_vm2, %v805_v51, -inf  ;;  %v976_v54 = vsel %vm961_vm2, %v881_v52, -inf  ;;  %v1627_v55 = vpop.f32.mrb[7].mxu1  ;;  %v1632_v56 = vpop.f32.mrb[9].mxu0 }
 0x256   : > { %v965_v57 = vrot.slane %v964_v50, 2  ;;  %v970_v58 = vrot.slane %v969_v53, 4  ;;  %v977_v59 = vrot.slane %v976_v54, 4 }
 0x258   : > { %v966_v60 = vmax.f32 %v964_v50, %v965_v57  ;;  %v971_v61 = vmax.f32 %v969_v53, %v970_v58  ;;  %v978_v62 = vmax.f32 %v976_v54, %v977_v59  ;;  %v957_v63 = vpop.f32.mrb[8].mxu1 }
 0x259   : > { %v983_v0 = vsel %vm961_vm2, %v957_v63, -inf  ;;  %v1637_v1 = vpop.f32.mrb[9].mxu1 }
 0x25a   : > { %v967_v2 = vrot.slane %v966_v60, 1  ;;  %v972_v3 = vrot.slane %v971_v61, 2  ;;  %v979_v4 = vrot.slane %v978_v62, 2  ;;  %v984_v5 = vrot.slane %v983_v0, 4 }
 0x25c   : > { %v968_v6 = vmax.f32 %v966_v60, %v967_v2  ;;  %v973_v7 = vmax.f32 %v971_v61, %v972_v3  ;;  %v980_v8 = vmax.f32 %v978_v62, %v979_v4  ;;  %v985_v9 = vmax.f32 %v983_v0, %v984_v5 }
 0x25d   : > { %v649_v0 = vadd.f32 %v2296_v19, %v2331_v45  ;;  %v654_v4 = vadd.f32 %v2329_v44, %v2296_v19 }
 0x25e   : > { %v990_v10 = vsub.f32 %v729_v46, %v968_v6  ;;  %v974_v11 = vrot.slane %v973_v7, 1  ;;  %v981_v12 = vrot.slane %v980_v8, 1  ;;  %v986_v13 = vrot.slane %v985_v9, 2 }
 0x260   : > { %v994_v14 = vmul.f32 1.442695, %v990_v10  ;;  %v975_v15 = vmax.f32 %v973_v7, %v974_v11  ;;  %v982_v17 = vmax.f32 %v980_v8, %v981_v12  ;;  %v987_v18 = vmax.f32 %v985_v9, %v986_v13 }
 0x262   : > { %1756 = vpow2.f32 %v994_v14  ;;  %v991_v20 = vsub.f32 %v805_v51, %v975_v15  ;;  %v992_v21 = vsub.f32 %v881_v52, %v982_v17  ;;  %v988_v22 = vrot.slane %v987_v18, 1 }
 0x264   : > { %v996_v23 = vmul.f32 1.442695, %v991_v20  ;;  %v998_v24 = vmul.f32 1.442695, %v992_v21  ;;  %v989_v25 = vmax.f32 %v987_v18, %v988_v22 }
 0x266   : > { %1758 = vpow2.f32 %v996_v23  ;;  %v993_v26 = vsub.f32 %v957_v63, %v989_v25 }
 0x267   : > { %1760 = vpow2.f32 %v998_v24 }
 0x268   : > { %v1000_v27 = vmul.f32 1.442695, %v993_v26 }
 0x26a   : > { %1762 = vpow2.f32 %v1000_v27 }
 0x26c   : > { %v1757_v28 = vpop.eup %1756 }
 0x26d   : > { %v1002_v29 = vsel %vm961_vm2, %v1757_v28, 0.0 }
 0x26e   : > { %v1003_v30 = vrot.slane %v1002_v29, 4 }
 0x270   : > { %v1759_v31 = vpop.eup %1758  ;;  %v1004_v32 = vadd.f32 %v1003_v30, %v1002_v29 }
 0x271   : > { %v1761_v33 = vpop.eup %1760  ;;  %v1009_v34 = vsel %vm961_vm2, %v1759_v31, 0.0 }
 0x272   : > { %v1005_v35 = vrot.slane %v1004_v32, 2  ;;  %v1010_v36 = vrot.slane %v1009_v34, 4  ;;  %v1016_v37 = vsel %vm961_vm2, %v1761_v33, 0.0 }
 0x273   : > { %v1017_v38 = vrot.slane %v1016_v37, 4 }
 0x274   : > { %v1763_v39 = vpop.eup %1762  ;;  %v1006_v40 = vadd.f32 %v1005_v35, %v1004_v32  ;;  %v1011_v41 = vadd.f32 %v1010_v36, %v1009_v34 }
 0x275   : > { %v1018_v42 = vadd.f32 %v1017_v38, %v1016_v37  ;;  %v1023_v43 = vsel %vm961_vm2, %v1763_v39, 0.0 }
 0x276   : > { %v1007_v46 = vrot.slane %v1006_v40, 1  ;;  %v1012_v47 = vrot.slane %v1011_v41, 2  ;;  %v1024_v48 = vrot.slane %v1023_v43, 4 }
 0x277   : > { %v1019_v49 = vrot.slane %v1018_v42, 2 }
 0x278   : > { %v1008_v50 = vadd.f32 %v1007_v46, %v1006_v40  ;;  %v1013_v51 = vadd.f32 %v1012_v47, %v1011_v41  ;;  %v1025_v52 = vadd.f32 %v1024_v48, %v1023_v43 }
 0x279   : > { %v1020_v53 = vadd.f32 %v1019_v49, %v1018_v42 }
 0x27a   : > { %1764 = vrcp.f32 %v1008_v50  ;;  %v1014_v54 = vrot.slane %v1013_v51, 1  ;;  %v1026_v55 = vrot.slane %v1025_v52, 2 }
 0x27b   : > { %v1021_v56 = vrot.slane %v1020_v53, 1 }
 0x27c   : > { %v1015_v57 = vadd.f32 %v1014_v54, %v1013_v51  ;;  %v1027_v58 = vadd.f32 %v1026_v55, %v1025_v52 }
 0x27d   : > { %v1022_v59 = vadd.f32 %v1021_v56, %v1020_v53 }
 0x27e   : > { %1766 = vrcp.f32 %v1015_v57  ;;  %v1028_v60 = vrot.slane %v1027_v58, 1 }
 0x27f   : > { %1768 = vrcp.f32 %v1022_v59 }
 0x280   : > { %v1029_v61 = vadd.f32 %v1028_v60, %v1027_v58 }
 0x282   : > { %1770 = vrcp.f32 %v1029_v61 }
 0x284   : > { %v1765_v62 = vpop.eup %1764 }
 0x285   : > { %v1034_v63 = vmul.f32 %v1765_v62, %v1757_v28 }
 0x287   : > { %1641 = vmatmul.mubr.msk.f32.vlgmr.msra.gmra.mrb[10].mxu0 %vm961_vm2, %v1034_v63 }
 0x288   : > { %v1767_v1 = vpop.eup %1766  ;;  %1649 = vmatpush3.msra.mxu0 %v649_v0  ;;  %1650 = vmatprep.mubr.msk.f32.mxu0 %vm1973_vm1, %v1972_v16 }
 0x289   : > { %v1769_v2 = vpop.eup %1768  ;;  %v1035_v3 = vmul.f32 %v1767_v1, %v1759_v31 }
 0x28a   : > { %v1036_v5 = vmul.f32 %v1769_v2, %v1761_v33 }
 0x28b   : > { %1646 = vmatmul.mubr.msk.f32.vlgmr.msra.gmra.mrb[10].mxu1 %vm961_vm2, %v1035_v3 }
 0x28c   : > { %v1771_v6 = vpop.eup %1770  ;;  %1651 = vmatmul.mubr.msk.f32.vlgmr.msra.gmra.mrb[12].mxu0 %vm961_vm2, %v1036_v5  ;;  %1654 = vmatpush3.msra.mxu1 %v654_v4 }
 0x28d   : > { %1655 = vmatprep.mubr.msk.f32.mxu1 %vm1973_vm1, %v1972_v16  ;;  %v1037_v45 = vmul.f32 %v1771_v6, %v1763_v39 }
 0x28f   : > { %1656 = vmatmul.mubr.msk.f32.vlgmr.msra.gmra.mrb[12].mxu1 %vm961_vm2, %v1037_v45 }
 0x35a   : > { %v1107_v7 = vpop.f32.mrb[10].mxu0 }
 0x35b   : > { %v1642_v8 = vpop.f32.mrb[11].mxu0 }
 0x35e   : > { %v1180_v9 = vpop.f32.mrb[10].mxu1 }
 0x35f   : > { %v1253_v10 = vpop.f32.mrb[12].mxu0  ;;  %1331 = vrot.lane.b32.xlu0 %v1180_v9, %s1974_s25  ;;  %v1647_v19 = vpop.f32.mrb[11].mxu1 }
 0x360   : > { %v1652_v44 = vpop.f32.mrb[13].mxu0 }
 0x362   : > { %v1326_v11 = vpop.f32.mrb[12].mxu1 }
 0x363   : > { %1335 = vrot.lane.b32.xlu0 %v1253_v10, %s1975_s20  ;;  %1339 = vrot.lane.b32.xlu1 %v1326_v11, %s1976_s21  ;;  %v1657_v12 = vpop.f32.mrb[13].mxu1 }
 0x3d1   : > { %v1332_v16 = vpop.permute.xlu0 %1331 }
 0x3d2   : > { %v1342_v13 = vsel %vm361_vm0, %v1107_v7, %v1332_v16 }
 0x3d5   : > { %v1336_v14 = vpop.permute.xlu0 %1335  ;;  %v1340_v15 = vpop.permute.xlu1 %1339 }
 0x3d6   : > { %v1344_v17 = vsel %vm1343_vm3, %v1342_v13, %v1336_v14 }
 0x3d7   : > { %v1346_v18 = vsel %vm1345_vm4, %v1344_v17, %v1340_v15 }
 0x3d8   : > { %1347 = vst [vmem:[%s334_s12] sm:$0xff] %v1346_v18 }
 0x3d9   : > { %1903 = shalt.err (!%p1900_p4)
}
 0x3da   : > { %s1904_s13 = scalar_lea.hbm %s2360_s30, 128  ;;  %s1908_s18 = scalar_lea.hbm %s2409_s5, 256 }
 0x3db   : > { %p1905_p7 = scmp.ne.s32.totalorder %s2360_s30, %s1904_s13  ;;  %p1909_p11 = scmp.lt.u32.totalorder %s2360_s30, %s2409_s5 }
 0x3dc   : > { %p1910_p0 = scmp.lt.u32.totalorder %s1908_s18, %s1904_s13  ;;  %p1912_p2 = scmp.lt.u32.totalorder %s1904_s13, %s2360_s30 }
 0x3dd   : > { %p1906_p5 = pnand %p1905_p7, %p2456_p12 }
 0x3de   : > { %p1911_p1 = por %p1910_p0, %p1909_p11 }
 0x3df   : > { %p1907_p8 = pneg %p1906_p5 }
 0x3e0   : > { %p1913_p10 = por %p1912_p2, %p1911_p1 }
 0x3e2   : > { %p1914_p13 = pnand %p1913_p10, %p1907_p8 }
 0x3e4   : > { %1917 = shalt.err (!%p1914_p13)
}
 0x3e5   : > { %1692 = dma.vmem_to_hbm [thread:$0]  (%p2456_p12), %s2362_s7, 128, %s2360_s30, %s1349_s14  }
 0x3e6 PF: > { %s2457_s11 = sld [smem:[#allocation15_spill]]  ;;  %s2458_s17 = sld [smem:[#allocation20_spill]] }
 0x3e7   : > { %s2459_s16 = sld [smem:[#allocation17_spill]] }
 0x3ec   : > { %s1374_s1 = sand.u32 1, %s2457_s11   ;;  %p2460_p3 = scmp.ne.s32.totalorder %s2458_s17, 0 }
 0x3ed   : > { %p2461_p9 = scmp.ge.s32.totalorder %s2459_s16, 2  ;;  %s1375_s25 = scalar_lea.sflag [#allocation4], %s1374_s1 }
 0x3ef   : > { %p1709_p6 = pnand %p2461_p9, %p2460_p3 }
 0x3f1   : > { %1947 = dma.done.wait (!%p1709_p6), %s1375_s25, 128  }
 0x3f2   : > { %1949 = vsyncadd (!%p1709_p6), %s1375_s25, 4294967168  ;;  %s2462_s21 = sld [smem:[#allocation18_spill]]  ;;  %s2463_s20 = sld [smem:[#allocation16_spill]] }
 0x3f3   : > { %s2464_s9 = sld [smem:[#allocation19_spill]]  ;;  %s2465_s18 = smov %s1956_s19 }
 0x3f8   : > { %p22_p4 = scmp.ge.s32.totalorder %s2462_s21, 4   ;;  %s2466_s19 = smov %s2463_s20 }
 0x3f9   : > { %s2467_s20 = smov %s2464_s9 }
 0x3fa   :  { %24 = sbr.rel (!%p22_p4) target bundleno = 11 (0xb), region = 113 }
 0x401   :  { %1380 = vsyncpa [#allocation3], 1 }
 0x402   :  { %1382 = vsyncpa [#allocation3 + $0x1], 1 }
 0x403   :  { %1383 = vsyncpa [#allocation6], 1 }
 0x404   :  { %1385 = vsyncpa [#allocation6 + $0x1], 1 }
 0x405   :  { %1386 = vsyncpa [#allocation9], 1 }
 0x406   :  { %1387 = vsyncpa [#allocation4], 1 }
 0x407   :  { %1389 = vsyncpa [#allocation4 + $0x1], 1 }

</bundles_post_ra>
